<compile_context>
chip_gen: v7x
topology: tpu7x:2x2x1
jax: 0.10.0
libtpu: 0.0.40
codegen_flags: <defaults>
</compile_context>

<pallas_src>
import functools
import math

import jax
import jax.numpy as jnp
from jax import lax
from jax.experimental import pallas as pl
from jax.experimental.pallas import tpu as pltpu

_INV_SQRT2 = 1.0 / math.sqrt(2.0)


def _round_up(x, m):
    return (x + m - 1) // m * m


def _cdiv(a, b):
    return (a + b - 1) // b


def _itemsize(dt):
    return jnp.dtype(dt).itemsize


# ---------------------------------------------------------------------------
# Kernel bodies
# ---------------------------------------------------------------------------
def _ffn_body(x_ref, w1_ref, b1_ref, w2_ref, approximate_gelu):
    # fc1 tile:  x (tm, d_model) . W1_tile (tff, d_model)^T  -> (tm, tff), f32
    h = lax.dot_general(
        x_ref[...], w1_ref[...],
        dimension_numbers=(((1,), (1,)), ((), ())),
        preferred_element_type=jnp.float32)
    h = h + b1_ref[...].astype(jnp.float32)

    # GELU in f32.  Exact erf matches torch F.gelu's default; the tanh form
    # rides the EUP slot and is the documented perf knob (small numerics diff).
    if approximate_gelu:
        c = math.sqrt(2.0 / math.pi)
        h = 0.5 * h * (1.0 + jnp.tanh(c * (h + 0.044715 * h * h * h)))
    else:
        h = 0.5 * h * (1.0 + lax.erf(h * _INV_SQRT2))

    # TODO(synk): training-mode dropout mask would be applied to `h` here.

    # fc2 partial product: h (tm, tff) . W2_tile (tff, d_model) -> (tm, d_model)
    return jnp.dot(h.astype(w2_ref.dtype), w2_ref[...],
                   preferred_element_type=jnp.float32)


def _ffn_kernel_f32_out(x_ref, w1_ref, b1_ref, w2_ref, b2_ref, o_ref, *,
                        approximate_gelu):
    """f32 output: accumulate directly into the resident output block."""
    j = pl.program_id(1)

    @pl.when(j == 0)
    def _():
        o_ref[...] = jnp.zeros_like(o_ref)

    o_ref[...] += _ffn_body(x_ref, w1_ref, b1_ref, w2_ref, approximate_gelu)

    @pl.when(j == pl.num_programs(1) - 1)
    def _():
        o_ref[...] += b2_ref[...].astype(o_ref.dtype)


def _ffn_kernel_acc(x_ref, w1_ref, b1_ref, w2_ref, b2_ref, o_ref, acc_ref, *,
                    approximate_gelu):
    """Low-precision output: f32 VMEM accumulator, cast on the last step."""
    j = pl.program_id(1)

    @pl.when(j == 0)
    def _():
        acc_ref[...] = jnp.zeros_like(acc_ref)

    acc_ref[...] += _ffn_body(x_ref, w1_ref, b1_ref, w2_ref, approximate_gelu)

    @pl.when(j == pl.num_programs(1) - 1)
    def _():
        o_ref[...] = (acc_ref[...]
                      + b2_ref[...].astype(jnp.float32)).astype(o_ref.dtype)


# ---------------------------------------------------------------------------
# Chip-aware defaults
# ---------------------------------------------------------------------------
def _tpu_defaults():
    """(row_tile, vmem_limit_bytes) derived from the chip's VMEM capacity."""
    vmem_cap = 64 * 1024 * 1024  # safe fallback (v7x-class per-TC VMEM)
    try:
        info = pltpu.get_tpu_info()
        vmem_cap = int(getattr(info, "vmem_capacity_bytes", vmem_cap))
    except Exception:
        pass
    # Leave ~15% headroom under the physical capacity for compiler scratch.
    vmem_limit = min(int(vmem_cap * 0.85), 110 * 1024 * 1024)
    if vmem_cap <= 64 * 1024 * 1024:      # v7x-class (64 MiB / TensorCore)
        row_tile = 512
    else:                                  # v5e / v6e (128 MiB)
        row_tile = 768
    return row_tile, vmem_limit


def _vmem_footprint_bytes(tm, tff, d_model, x_isz, w_isz, out_isz, use_scratch):
    fp = 2 * tm * d_model * x_isz          # x tiles (double buffered)
    fp += 2 * 2 * tff * d_model * w_isz    # W1 + W2 tiles (double buffered)
    fp += 2 * tm * d_model * out_isz       # output tiles
    fp += 2 * (tff + d_model) * 4          # bias tiles
    if use_scratch:
        fp += tm * d_model * 4             # f32 accumulator
    return fp


# ---------------------------------------------------------------------------
# One-time parameter preparation (NOT the per-step hot path)
# ---------------------------------------------------------------------------
def prepare_ffn_params(fc1_w, fc1_b, fc2_w, fc2_b, *, ff_tile=1024,
                       weight_dtype=jnp.bfloat16):
    """Pad / lay out / cast the weights once.

    fc1_w: (d_ff, d_model)   torch nn.Linear fc1.weight (native layout, kept)
    fc1_b: (d_ff,)
    fc2_w: (d_model, d_ff)   torch nn.Linear fc2.weight (transposed once here)
    fc2_b: (d_model,)
    weight_dtype: bf16 by default (MXU-native); None keeps the original dtype.
    """
    d_ff, d_model = fc1_w.shape

    # d_ff reduction tile: lane multiple of 128, capped by (padded) d_ff.
    tff = _round_up(min(ff_tile, _round_up(d_ff, 128)), 128)
    d_ff_p = _round_up(d_ff, tff)

    w1 = fc1_w                        # (d_ff, d_model) -- row-contiguous tiles
    w2 = fc2_w.T                      # (d_ff, d_model) -- one-time transpose
    b1 = fc1_b
    if d_ff_p != d_ff:
        # gelu(0) = 0 and the padded W2 rows are zero -> padded columns of the
        # reduction axis contribute nothing to the output.
        pad = d_ff_p - d_ff
        w1 = jnp.pad(w1, ((0, pad), (0, 0)))
        w2 = jnp.pad(w2, ((0, pad), (0, 0)))
        b1 = jnp.pad(b1, ((0, pad),))

    if weight_dtype is not None:
        w1 = w1.astype(weight_dtype)
        w2 = w2.astype(weight_dtype)

    return dict(
        w1=w1,
        b1=b1.reshape(1, d_ff_p).astype(jnp.float32),
        w2=w2,
        b2=fc2_b.reshape(1, d_model).astype(jnp.float32),
        tff=tff,
        d_model=d_model,
    )


# ---------------------------------------------------------------------------
# Hot-path wrapper
# ---------------------------------------------------------------------------
def positionwise_ffn(x, params, *, row_tile=None, vmem_limit_bytes=None,
                     approximate_gelu=False):
    """fc2(gelu(fc1(x))) with dropout as identity (eval mode)."""
    w1, b1_2d = params["w1"], params["b1"]
    w2, b2_2d = params["w2"], params["b2"]
    tff = params["tff"]
    d_model = params["d_model"]
    d_ff_p = w1.shape[0]

    orig_shape = x.shape
    out_dtype = x.dtype

    # MXU operands match the weight dtype (bf16 by default); f32 weights keep x f32.
    x2 = x.reshape(-1, d_model).astype(w1.dtype)
    n_rows = x2.shape[0]

    default_row_tile, default_vmem = _tpu_defaults()
    if row_tile is None:
        row_tile = default_row_tile
    if vmem_limit_bytes is None:
        vmem_limit_bytes = default_vmem

    out_is_f32 = (out_dtype == jnp.float32)

    # Sublane packing granularity for the compute dtype (8 f32, 16 bf16, ...).
    sub = max(8, 32 // _itemsize(x2.dtype))

    # Row tile: big by default, clamped for tiny inputs.
    tm = _round_up(min(row_tile, _round_up(n_rows, sub)), sub)
    # Ensure >=2 row tiles when possible so v7x's second TensorCore is used.
    if n_rows > sub and _cdiv(n_rows, tm) < 2:
        tm = _round_up(_cdiv(n_rows, 2), sub)
    # Shrink tm if the double-buffered footprint would overflow the VMEM budget.
    budget = int(0.8 * vmem_limit_bytes)
    while tm > sub and _vmem_footprint_bytes(
            tm, tff, d_model, _itemsize(x2.dtype), _itemsize(w1.dtype),
            _itemsize(out_dtype), not out_is_f32) > budget:
        tm = _round_up(tm // 2, sub)

    n_rows_p = _round_up(n_rows, tm)
    if n_rows_p != n_rows:
        x2 = jnp.pad(x2, ((0, n_rows_p - n_rows), (0, 0)))

    grid = (n_rows_p // tm, d_ff_p // tff)
    n_row_tiles = grid[0]

    # Accurate-ish traffic: W1/W2 are re-streamed once per row tile.
    w_bytes = (w1.size * _itemsize(w1.dtype)) + (w2.size * _itemsize(w2.dtype))
    cost = pl.CostEstimate(
        flops=4 * n_rows_p * d_model * d_ff_p,
        transcendentals=n_rows_p * d_ff_p,
        bytes_accessed=(x2.size * _itemsize(x2.dtype)
                        + n_rows_p * d_model * _itemsize(out_dtype)
                        + n_row_tiles * w_bytes
                        + b1_2d.size * 4 + b2_2d.size * 4),
    )

    in_specs = [
        pl.BlockSpec((tm, d_model), lambda i, j: (i, 0)),   # x row tile
        pl.BlockSpec((tff, d_model), lambda i, j: (j, 0)),  # W1 row tile (contig)
        pl.BlockSpec((1, tff),       lambda i, j: (0, j)),  # b1 tile
        pl.BlockSpec((tff, d_model), lambda i, j: (j, 0)),  # W2 row tile (contig)
        pl.BlockSpec((1, d_model),   lambda i, j: (0, 0)),  # b2 (constant)
    ]
    out_spec = pl.BlockSpec((tm, d_model), lambda i, j: (i, 0))

    if out_is_f32:
        kernel = functools.partial(_ffn_kernel_f32_out,
                                   approximate_gelu=approximate_gelu)
        scratch_shapes = []
    else:
        kernel = functools.partial(_ffn_kernel_acc,
                                   approximate_gelu=approximate_gelu)
        scratch_shapes = [pltpu.VMEM((tm, d_model), jnp.float32)]

    out = pl.pallas_call(
        kernel,
        out_shape=jax.ShapeDtypeStruct((n_rows_p, d_model), out_dtype),
        grid_spec=pltpu.PrefetchScalarGridSpec(
            num_scalar_prefetch=0,
            grid=grid,
            in_specs=in_specs,
            out_specs=out_spec,
            scratch_shapes=scratch_shapes,
        ),
        compiler_params=pltpu.CompilerParams(
            dimension_semantics=("parallel", "arbitrary"),
            vmem_limit_bytes=vmem_limit_bytes,
        ),
        cost_estimate=cost,
    )(x2, w1, b1_2d, w2, b2_2d)

    out = out[:n_rows]
    return out.reshape(orig_shape[:-1] + (d_model,))


# ---------------------------------------------------------------------------
# Reference + test harness
# ---------------------------------------------------------------------------
def _reference(x, fc1_w, fc1_b, fc2_w, fc2_b):
    h = x @ fc1_w.T + fc1_b
    h = jax.nn.gelu(h, approximate=False)
    return h @ fc2_w.T + fc2_b


def _make_torch_params(key, d_model, d_ff):
    """torch nn.Linear-style init and layouts."""
    k1, k2, k3, k4 = jax.random.split(key, 4)
    bound1 = 1.0 / math.sqrt(d_model)
    fc1_w = jax.random.uniform(k1, (d_ff, d_model), jnp.float32, -bound1, bound1)
    fc1_b = jax.random.uniform(k2, (d_ff,), jnp.float32, -bound1, bound1)
    bound2 = 1.0 / math.sqrt(d_ff)
    fc2_w = jax.random.uniform(k3, (d_model, d_ff), jnp.float32, -bound2, bound2)
    fc2_b = jax.random.uniform(k4, (d_model,), jnp.float32, -bound2, bound2)
    return fc1_w, fc1_b, fc2_w, fc2_b


if __name__ == "__main__":
    key = jax.random.PRNGKey(0)
    kx1, kp1, kx2, kp2 = jax.random.split(key, 4)

    # --- Case 1: lane-aligned shapes (no d_ff padding) -----------------------
    batch, seq, d_model, d_ff = 2, 8, 128, 256
    x = jax.random.normal(kx1, (batch, seq, d_model), dtype=jnp.float32)
    fc1_w, fc1_b, fc2_w, fc2_b = _make_torch_params(kp1, d_model, d_ff)
    ref = _reference(x, fc1_w, fc1_b, fc2_w, fc2_b)

    # f32 weight path: exact-precision check.
    params_f32 = prepare_ffn_params(fc1_w, fc1_b, fc2_w, fc2_b, weight_dtype=None)
    out_f32 = jax.block_until_ready(positionwise_ffn(x, params_f32))
    assert out_f32.shape == (batch, seq, d_model)
    assert jnp.allclose(out_f32, ref, atol=1e-4, rtol=1e-4), "mismatch (case 1, f32)"

    # Default bf16 MXU-operand path (f32 accumulation): looser tolerance.
    params_bf16 = prepare_ffn_params(fc1_w, fc1_b, fc2_w, fc2_b)
    out_bf16 = jax.block_until_ready(positionwise_ffn(x, params_bf16))
    assert out_bf16.shape == (batch, seq, d_model)
    assert jnp.allclose(out_bf16, ref, atol=3e-2, rtol=3e-2), "mismatch (case 1, bf16)"

    # --- Case 2: ragged rows + d_ff that needs reduction-axis zero padding ---
    batch2, seq2, d_model2, d_ff2 = 3, 5, 128, 200
    x2 = jax.random.normal(kx2, (batch2, seq2, d_model2), dtype=jnp.float32)
    w1b, b1b, w2b, b2b = _make_torch_params(kp2, d_model2, d_ff2)
    params2 = prepare_ffn_params(w1b, b1b, w2b, b2b, weight_dtype=None)
    out2 = jax.block_until_ready(positionwise_ffn(x2, params2))
    ref2 = _reference(x2, w1b, b1b, w2b, b2b)
    assert out2.shape == (batch2, seq2, d_model2)
    assert jnp.allclose(out2, ref2, atol=1e-4, rtol=1e-4), "mismatch (case 2)"

    print("KERNEL_OK")
</pallas_src>

<mosaic_0001>
module attributes {stable_mosaic.version = 11 : i64} {
  func.func @_ffn_kernel_f32_out(%arg0: i32, %arg1: i32, %arg2: memref<8x128xf32, #tpu.memory_space<vmem>>, %arg3: memref<256x128xf32, #tpu.memory_space<vmem>>, %arg4: memref<1x256xf32, #tpu.memory_space<vmem>>, %arg5: memref<256x128xf32, #tpu.memory_space<vmem>>, %arg6: memref<1x128xf32, #tpu.memory_space<vmem>>, %arg7: memref<8x128xf32, #tpu.memory_space<vmem>>) attributes {dimension_semantics = [#tpu.dimension_semantics<parallel>, #tpu.dimension_semantics<arbitrary>], iteration_bounds = array<i64: 2, 1>, scalar_prefetch = 0 : i64, scratch_operands = 0 : i64, tpu.core_type = #tpu.core_type<tc>, window_params = [{transform_indices = @transform_0, window_bounds = array<i64: 8, 128>}, {transform_indices = @transform_1, window_bounds = array<i64: 256, 128>}, {transform_indices = @transform_2, window_bounds = array<i64: 1, 256>}, {transform_indices = @transform_3, window_bounds = array<i64: 256, 128>}, {pipeline_mode = #tpu.pipeline_mode<synchronous>, transform_indices = @transform_4, window_bounds = array<i64: 1, 128>}, {transform_indices = @transform_5, window_bounds = array<i64: 8, 128>}]} {
    %c0_i32 = arith.constant 0 : i32
    %0 = arith.cmpi eq, %arg1, %c0_i32 : i32
    %1 = arith.extui %0 : i1 to i32
    %c0_i32_0 = arith.constant 0 : i32
    %2 = arith.cmpi ne, %1, %c0_i32_0 : i32
    scf.if %2 {
      %cst_18 = arith.constant 0.000000e+00 : f32
      %25 = vector.broadcast %cst_18 : f32 to vector<8x128xf32>
      %c0_19 = arith.constant 0 : index
      %c0_20 = arith.constant 0 : index
      %26 = vector.load %arg7[%c0_19, %c0_20] : memref<8x128xf32, #tpu.memory_space<vmem>>, vector<8x128xf32>
      tpu.vector_store %arg7[%c0_19, %c0_20], %25 {strides = array<i32>} : memref<8x128xf32, #tpu.memory_space<vmem>>, vector<8x128xf32>,
    } else {
    }
    %c0 = arith.constant 0 : index
    %c0_1 = arith.constant 0 : index
    %3 = vector.load %arg7[%c0, %c0_1] : memref<8x128xf32, #tpu.memory_space<vmem>>, vector<8x128xf32>
    %c0_2 = arith.constant 0 : index
    %c0_3 = arith.constant 0 : index
    %4 = vector.load %arg2[%c0_2, %c0_3] : memref<8x128xf32, #tpu.memory_space<vmem>>, vector<8x128xf32>
    %c0_4 = arith.constant 0 : index
    %c0_5 = arith.constant 0 : index
    %5 = vector.load %arg3[%c0_4, %c0_5] : memref<256x128xf32, #tpu.memory_space<vmem>>, vector<256x128xf32>
    %cst = arith.constant dense<0.000000e+00> : vector<8x256xf32>
    %6 = tpu.matmul %4, %5, %cst {dimension_numbers = #tpu.dot_dimension_numbers<[1], [1], [0], [0], [0, 0, 1, 0], [], []>} : vector<8x128xf32>, vector<256x128xf32>, vector<8x256xf32> -> vector<8x256xf32>
    %c0_6 = arith.constant 0 : index
    %c0_7 = arith.constant 0 : index
    %7 = vector.load %arg4[%c0_6, %c0_7] : memref<1x256xf32, #tpu.memory_space<vmem>>, vector<1x256xf32>
    %8 = vector.broadcast %7 : vector<1x256xf32> to vector<8x256xf32>
    %9 = arith.addf %6, %8 : vector<8x256xf32>
    %cst_8 = arith.constant 5.000000e-01 : f32
    %10 = vector.broadcast %cst_8 : f32 to vector<8x256xf32>
    %11 = arith.mulf %10, %9 : vector<8x256xf32>
    %cst_9 = arith.constant 0.707106769 : f32
    %12 = vector.broadcast %cst_9 : f32 to vector<8x256xf32>
    %13 = arith.mulf %9, %12 : vector<8x256xf32>
    %14 = math.erf %13 : vector<8x256xf32>
    %cst_10 = arith.constant 1.000000e+00 : f32
    %15 = vector.broadcast %cst_10 : f32 to vector<8x256xf32>
    %16 = arith.addf %15, %14 : vector<8x256xf32>
    %17 = arith.mulf %11, %16 : vector<8x256xf32>
    %c0_11 = arith.constant 0 : index
    %c0_12 = arith.constant 0 : index
    %18 = vector.load %arg5[%c0_11, %c0_12] : memref<256x128xf32, #tpu.memory_space<vmem>>, vector<256x128xf32>
    %cst_13 = arith.constant dense<0.000000e+00> : vector<8x128xf32>
    %19 = tpu.matmul %17, %18, %cst_13 {dimension_numbers = #tpu.dot_dimension_numbers<[1], [0], [0], [1], [0, 0, 1, 1], [], []>} : vector<8x256xf32>, vector<256x128xf32>, vector<8x128xf32> -> vector<8x128xf32>
    %20 = arith.addf %3, %19 : vector<8x128xf32>
    %c0_14 = arith.constant 0 : index
    %c0_15 = arith.constant 0 : index
    %21 = vector.load %arg7[%c0_14, %c0_15] : memref<8x128xf32, #tpu.memory_space<vmem>>, vector<8x128xf32>
    tpu.vector_store %arg7[%c0_14, %c0_15], %20 {strides = array<i32>} : memref<8x128xf32, #tpu.memory_space<vmem>>, vector<8x128xf32>,
    %c0_i32_16 = arith.constant 0 : i32
    %22 = arith.cmpi eq, %arg1, %c0_i32_16 : i32
    %23 = arith.extui %22 : i1 to i32
    %c0_i32_17 = arith.constant 0 : i32
    %24 = arith.cmpi ne, %23, %c0_i32_17 : i32
    scf.if %24 {
      %c0_18 = arith.constant 0 : index
      %c0_19 = arith.constant 0 : index
      %25 = vector.load %arg7[%c0_18, %c0_19] : memref<8x128xf32, #tpu.memory_space<vmem>>, vector<8x128xf32>
      %c0_20 = arith.constant 0 : index
      %c0_21 = arith.constant 0 : index
      %26 = vector.load %arg6[%c0_20, %c0_21] : memref<1x128xf32, #tpu.memory_space<vmem>>, vector<1x128xf32>
      %27 = vector.broadcast %26 : vector<1x128xf32> to vector<8x128xf32>
      %28 = arith.addf %25, %27 : vector<8x128xf32>
      %c0_22 = arith.constant 0 : index
      %c0_23 = arith.constant 0 : index
      %29 = vector.load %arg7[%c0_22, %c0_23] : memref<8x128xf32, #tpu.memory_space<vmem>>, vector<8x128xf32>
      tpu.vector_store %arg7[%c0_22, %c0_23], %28 {strides = array<i32>} : memref<8x128xf32, #tpu.memory_space<vmem>>, vector<8x128xf32>,
    } else {
    }
    return
  }
  func.func @transform_0(%arg0: i32, %arg1: i32) -> (i32, i32) {
    %c0_i32 = arith.constant 0 : i32
    %c0_i32_0 = arith.constant 0 : i32
    return %arg0, %c0_i32 : i32, i32
  }
  func.func @transform_1(%arg0: i32, %arg1: i32) -> (i32, i32) {
    %c0_i32 = arith.constant 0 : i32
    %c0_i32_0 = arith.constant 0 : i32
    return %arg1, %c0_i32 : i32, i32
  }
  func.func @transform_2(%arg0: i32, %arg1: i32) -> (i32, i32) {
    %c0_i32 = arith.constant 0 : i32
    %c0_i32_0 = arith.constant 0 : i32
    return %c0_i32, %arg1 : i32, i32
  }
  func.func @transform_3(%arg0: i32, %arg1: i32) -> (i32, i32) {
    %c0_i32 = arith.constant 0 : i32
    %c0_i32_0 = arith.constant 0 : i32
    return %arg1, %c0_i32 : i32, i32
  }
  func.func @transform_4(%arg0: i32, %arg1: i32) -> (i32, i32) {
    %c0_i32 = arith.constant 0 : i32
    %c0_i32_0 = arith.constant 0 : i32
    %c0_i32_1 = arith.constant 0 : i32
    return %c0_i32, %c0_i32_0 : i32, i32
  }
  func.func @transform_5(%arg0: i32, %arg1: i32) -> (i32, i32) {
    %c0_i32 = arith.constant 0 : i32
    %c0_i32_0 = arith.constant 0 : i32
    return %arg0, %c0_i32 : i32, i32
  }
}

</mosaic_0001>

<bundles_post_ra>
// kernel: tpu_custom_call.1
= control target key start
LH: loop header
LB: loop body
LE: loop exit
PB: predicated region body
PF: predicated region fallthrough
CT: control target
= control target key end

     0   :  { %10 = vsyncpa [#allocation3], 0  ;;  %s1410_s0 = inlined_call_operand.hbm [shape: f32[16,128], index: 0, kind: input, shape index: {}]   ;;  %s1411_s1 = inlined_call_operand.hbm [shape: f32[256,128], index: 1, kind: input, shape index: {}]   ;;  %s1412_s2 = inlined_call_operand.vmem [shape: f32[1,256], index: 2, kind: input, shape index: {}]   ;;  %s1413_s3 = inlined_call_operand.hbm [shape: f32[256,128], index: 3, kind: input, shape index: {}]   ;;  %s1414_s4 = inlined_call_operand.vmem [shape: f32[1,128], index: 4, kind: input, shape index: {}]   ;;  %s1415_s5 = inlined_call_operand.hbm [shape: f32[16,128], index: 5, kind: output, shape index: {}]  }
   0x1   :  { %12 = vsyncpa [#allocation3 + $0x1], 0 }
   0x2   :  { %13 = vsyncpa [#allocation6], 0 }
   0x3   :  { %14 = vsyncpa [#allocation4], 0 }
   0x4   :  { %16 = vsyncpa [#allocation4 + $0x1], 0  ;;  %s1146_s18 = smov 0   ;;  %s1148_s19 = smov 0  }
   0x5   :  { %s1150_s20 = smov 0   ;;  %s1152_s21 = smov 0  }
   0x6   :  { %s1154_s22 = smov 0   ;;  %s1156_s23 = smov 0  }
   0x7 LB: > { %s694_s24 = sadd.s32 4294967295, %s1108_s23   ;;  %s695_s25 = sadd.s32 4294967294, %s1108_s23   ;;  %s1108_s23 = sphi %s1156_s23, %s22_s23   ;;  %s1104_s22 = sphi %s1154_s22, %s1437_s22   ;;  %s1100_s21 = sphi %s1152_s21, %s1436_s21   ;;  %s1096_s20 = sphi %s1150_s20, %s1435_s20   ;;  %s1092_s19 = sphi %s1148_s19, %s1434_s19   ;;  %s1088_s18 = sphi %s1146_s18, %s1433_s18  }
   0x8   : > { %p54_p0 = scmp.ne.s32.totalorder %s1092_s19, %s1088_s18  ;;  %p1180_p1 = scmp.eq.s32.totalorder %s694_s24, 0 }
   0x9   : > { %p1184_p2 = scmp.eq.s32.totalorder %s694_s24, 1  ;;  %p183_p3 = scmp.eq.s32.totalorder %s695_s25, 1 }
   0xa   : > { %s1420_s26 = scalar_select %p1180_p1, 1, 0 }
   0xb   : > { %p1190_p4 = por %p1180_p1, %p54_p0  ;;  %p696_p5 = scmp.ge.s32.totalorder %s1108_s23, 1 }
   0xc   : > { %p1195_p6 = por %p183_p3, %p54_p0  ;;  %p190_p7 = scmp.lt.s32.totalorder %s1108_s23, 3 }
   0xd   : > { %s1422_s28 = scalar_select %p1190_p4, 1, 0 }
   0xe   : > { %s1423_s29 = scalar_select %p1195_p6, 1, 0 }
   0xf   : > { %p1200_p8 = pnand %p696_p5, %p190_p7  ;;  %s1110_s6 = smov [#allocation5]  }
  0x10   : > { %s205_s7 = sshll.u32 %s1110_s6, 4  ;;  %s1111_s9 = smov [#allocation7]   ;;  %s1204_s7 = int_to_ptr.vmem [resolvable:$true] %s205_s7 }
  0x11   : > { %p858_p9 = pneg %p1200_p8  ;;  %s229_s10 = sshll.u32 %s1111_s9, 4  ;;  %s1215_s10 = int_to_ptr.vmem [resolvable:$true] %s229_s10 }
  0x12   : > { %s936_s13 = scalar_lea.hbm %s1411_s1, 4096 }
  0x13   : > { %p1211_p11 = pnand %p858_p9, %p1180_p1  ;;  %p937_p12 = scmp.ne.s32.totalorder %s1411_s1, %s936_s13 }
  0x14   : > { %p943_p5 = scmp.lt.u32.totalorder %s936_s13, %s1411_s1 }
  0x15   : > { %p938_p13 = pneg %p1211_p11 }
  0x17   : > { %p939_p0 = pnand %p938_p13, %p937_p12 }
  0x19   : > { %p940_p3 = pneg %p939_p0 }
  0x1b   : > { %p945_p7 = pnand %p943_p5, %p940_p3 }
  0x1d   : > { %948 = shalt.err (!%p945_p7)
}
  0x1e   : > { %s949_s24 = scalar_lea.vmem %s1204_s7, 4096  ;;  %p957_p1 = scmp.lt.s32.totalorder %s1204_s7, %s1204_s7 }
  0x1f   : > { %p950_p9 = scmp.ne.s32.totalorder %s1204_s7, %s949_s24  ;;  %p958_p12 = scmp.lt.s32.totalorder %s949_s24, %s949_s24 }
  0x21   : > { %p952_p10 = pnand %p950_p9, %p938_p13  ;;  %p959_p0 = por %p958_p12, %p957_p1 }
  0x23   : > { %p953_p6 = pneg %p952_p10 }
  0x25   : > { %p960_p4 = pnand %p959_p0, %p953_p6 }
  0x27   : > { %963 = shalt.err (!%p960_p4)
}
  0x28   : > { %s1112_s25 = smov 128   ;;  %s1113_s6 = smov 8  }
  0x29   : > { %861 = dma.hbm_to_vmem [thread:$0]  (!%p1211_p11), %s1411_s1, 4096, %s1204_s7, [#allocation6], %s1112_s25, %s1112_s25, %s1113_s6  }
  0x2a   : > { %s964_s14 = scalar_lea.hbm %s1413_s3, 4096 }
  0x2b   : > { %p965_p1 = scmp.ne.s32.totalorder %s1413_s3, %s964_s14  ;;  %p971_p10 = scmp.lt.u32.totalorder %s964_s14, %s1413_s3 }
  0x2d   : > { %p967_p4 = pnand %p965_p1, %p938_p13 }
  0x2f   : > { %p968_p6 = pneg %p967_p4 }
  0x31   : > { %p973_p3 = pnand %p971_p10, %p968_p6 }
  0x33   : > { %976 = shalt.err (!%p973_p3)
}
  0x34   : > { %s977_s7 = scalar_lea.vmem %s1215_s10, 4096  ;;  %p985_p12 = scmp.lt.s32.totalorder %s1215_s10, %s1215_s10 }
  0x35   : > { %p978_p5 = scmp.ne.s32.totalorder %s1215_s10, %s977_s7  ;;  %p986_p0 = scmp.lt.s32.totalorder %s977_s7, %s977_s7 }
  0x37   : > { %p980_p7 = pnand %p978_p5, %p938_p13  ;;  %p987_p1 = por %p986_p0, %p985_p12 }
  0x39   : > { %p981_p9 = pneg %p980_p7 }
  0x3b   : > { %p988_p4 = pnand %p987_p1, %p981_p9 }
  0x3d   : > { %991 = shalt.err (!%p988_p4)
}
  0x3e   : > { %864 = dma.hbm_to_vmem [thread:$0]  (!%p1211_p11), %s1413_s3, 4096, %s1215_s10, [#allocation6], %s1112_s25, %s1112_s25, %s1113_s6  }
  0x3f   : > { %s34_s12 = sadd.s32 1, %s1104_s22  ;;  %s41_s13 = sadd.s32 1, %s1096_s20 }
  0x40   : > { %p36_p13 = scmp.ge.s32.totalorder %s34_s12, 2  ;;  %p48_p6 = scmp.ne.s32.totalorder %s1096_s20, %s1092_s19 }
  0x41   : > { %p49_p10 = scmp.eq.s32.totalorder %s1108_s23, 0  ;;  %p875_p3 = scmp.lt.s32.totalorder %s1108_s23, 2 }
  0x42   : > { %s1439_s12 = smov (%p36_p13, %s34_s12), 0  ;;  %p1279_p7 = por %p1184_p2, %p48_p6 }
  0x43   : > { %p50_p5 = por %p49_p10, %p48_p6  ;;  %s38_s14 = ssub.s32 %s1104_s22, %s1439_s12 }
  0x44   : > { %s1426_s8 = scalar_select %p1279_p7, 1, 0 }
  0x45   : > { %s246_s15 = sand.u32 1, %s1096_s20   ;;  %p39_p9 = scmp.eq.s32.totalorder %s38_s14, 0 }
  0x46   : > { %s701_s10 = sshll.u32 %s246_s15, 3  ;;  %s702_s25 = sshll.u32 %s1104_s22, 7 }
  0x47   : > { %s1288_s6 = scalar_select %p39_p9, %s1096_s20, %s41_s13  }
  0x48   : > { %s1293_s24 = scalar_lea.hbm %s1410_s0, %s702_s25  ;;  %s250_s27 = scalar_lea.vmem [#allocation2], %s701_s10 }
  0x49   : > { %s257_s7 = sshll.u32 %s250_s27, 4  ;;  %p1297_p2 = pnand %p875_p3, %p50_p5  ;;  %s1301_s7 = int_to_ptr.vmem [resolvable:$true] %s257_s7 }
  0x4a   : > { %s247_s11 = scalar_lea.sflag [#allocation3], %s246_s15  ;;  %s992_s13 = scalar_lea.hbm %s1293_s24, 128 }
  0x4b   : > { %p993_p11 = scmp.ne.s32.totalorder %s1293_s24, %s992_s13  ;;  %p994_p12 = pneg %p1297_p2 }
  0x4c   : > { %s997_s25 = scalar_lea.hbm %s1410_s0, 256  ;;  %p998_p4 = scmp.lt.u32.totalorder %s1293_s24, %s1410_s0 }
  0x4d   : > { %p995_p0 = pnand %p994_p12, %p993_p11  ;;  %p999_p13 = scmp.lt.u32.totalorder %s997_s25, %s992_s13 }
  0x4e   : > { %p1001_p10 = scmp.lt.u32.totalorder %s992_s13, %s1293_s24 }
  0x4f   : > { %p996_p1 = pneg %p995_p0  ;;  %p1000_p6 = por %p999_p13, %p998_p4 }
  0x51   : > { %p1002_p3 = por %p1001_p10, %p1000_p6 }
  0x53   : > { %p1003_p5 = pnand %p1002_p3, %p996_p1 }
  0x55   : > { %1006 = shalt.err (!%p1003_p5)
}
  0x56   : > { %s1007_s15 = scalar_lea.vmem %s1301_s7, 128  ;;  %s1114_s27 = smov [#allocation2]  }
  0x57   : > { %p1008_p9 = scmp.ne.s32.totalorder %s1301_s7, %s1007_s15  ;;  %s1012_s14 = sshll.u32 %s1114_s27, 4  ;;  %s1013_s14 = int_to_ptr.vmem [resolvable:$false] %s1012_s14 }
  0x58   : > { %s1014_s10 = scalar_lea.vmem %s1013_s14, 256  ;;  %p1015_p7 = scmp.lt.s32.totalorder %s1301_s7, %s1013_s14 }
  0x59   : > { %p1010_p11 = pnand %p1008_p9, %p994_p12  ;;  %p1016_p4 = scmp.lt.s32.totalorder %s1014_s10, %s1007_s15 }
  0x5b   : > { %p1011_p0 = pneg %p1010_p11  ;;  %p1017_p13 = por %p1016_p4, %p1015_p7 }
  0x5d   : > { %p1018_p6 = pnand %p1017_p13, %p1011_p0 }
  0x5f   : > { %1021 = shalt.err (!%p1018_p6)
}
  0x60   : > { %868 = dma.hbm_to_vmem [thread:$0]  (!%p1297_p2), %s1293_s24, 128, %s1301_s7, %s247_s11  }
  0x61   : > { %266 = sbr.rel (%p1200_p8) target bundleno = 639 (0x27f), region = 40  ;;  %s1331_s13 = sand.u32 (!%p1200_p8), 1, %s1092_s19  }
  0x62   : > { %s704_s25 = sshll.u32 (!%p1200_p8), %s1331_s13, 3  ;;  %s269_s16 = scalar_lea.sflag (!%p1200_p8), [#allocation3], %s1331_s13 }
  0x63   : > { %s272_s17 = scalar_lea.vmem (!%p1200_p8), [#allocation2], %s704_s25  ;;  %p1428_p7 = scmp.ne.s32.totalorder (!%p1200_p8), %s1422_s28, 0 }
  0x68   : > { %1075 = dma.done.wait (%p1428_p7), %s269_s16, 128  }
  0x69   : > { %1077 = vsyncadd (%p1428_p7), %s269_s16, 4294967168  ;;  %p1429_p2 = scmp.ne.s32.totalorder %s1420_s26, 0 }
  0x6b   : > { %1079 = dma.done.wait (%p1429_p2), [#allocation6], 8192  }
  0x6c   : > { %1081 = vsyncadd (%p1429_p2), [#allocation6], 4294959104  ;;  %v341_v0 = vld [vmem:[#allocation5 + $0x80] sm:$0xff]  ;;  %v342_v1 = vld [vmem:[#allocation5 + $0x88] sm:$0xff]  ;;  %s710_s7 = sshll.u32 %s1100_s21, 7  ;;  %s310_s9 = scalar_lea.vmem [#allocation8], %s704_s25 }
  0x6d   : > { %v325_v2 = vld [vmem:[#allocation5] sm:$0xff]  ;;  %v782_v3 = vpack.c.bf16 %v342_v1, %v341_v0  ;;  %v326_v4 = vld [vmem:[#allocation5 + $0x8] sm:$0xff]  ;;  %v343_v5 = vld [vmem:[#allocation5 + $0x90] sm:$0xff]  ;;  %s581_s11 = sshll.u32 %s310_s9, 4  ;;  %s1361_s14 = scalar_lea.hbm %s1415_s5, %s710_s7  ;;  %s1363_s11 = int_to_ptr.vmem [resolvable:$true] %s581_s11 }
  0x6e   : > { %v344_v6 = vld [vmem:[#allocation5 + $0x98] sm:$0xff]  ;;  %v784_v7 = vpack.c.bf16 %v326_v4, %v325_v2  ;;  %v327_v9 = vld [vmem:[#allocation5 + $0x10] sm:$0xff]  ;;  %v345_v11 = vld [vmem:[#allocation5 + $0xa0] sm:$0xff]  ;;  %s568_s10 = scalar_lea.sflag [#allocation4], %s1331_s13  ;;  %s1022_s16 = scalar_lea.vmem %s1363_s11, 128 }
  0x6f   : > { %v786_v8 = vpack.c.bf16 %v344_v6, %v343_v5  ;;  %783 = vmatprep.subr.bf16.mxu0 %v782_v3  ;;  %v328_v10 = vld [vmem:[#allocation5 + $0x18] sm:$0xff]  ;;  %v346_v12 = vld [vmem:[#allocation5 + $0xa8] sm:$0xff]  ;;  %v329_v16 = vld [vmem:[#allocation5 + $0x20] sm:$0xff]  ;;  %p1023_p8 = scmp.ne.s32.totalorder %s1363_s11, %s1022_s16  ;;  %p1430_p12 = scmp.ne.s32.totalorder %s1426_s8, 0 }
  0x70   : > { %785 = vmatpush3.bf16.xpose.msra.mxu0 %v784_v7  ;;  %v788_v13 = vpack.c.bf16 %v328_v10, %v327_v9  ;;  %v790_v14 = vpack.c.bf16 %v346_v12, %v345_v11  ;;  %v1345_v15 = vld [vmem:[%s272_s17] sm:$0xff]  ;;  %v330_v17 = vld [vmem:[#allocation5 + $0x28] sm:$0xff]  ;;  %v466_v18 = vld [vmem:[#allocation7 + $0x80] sm:$0xff]  ;;  %s1115_s21 = smov [#allocation8]  }
  0x71   : > { %787 = vmatprep.subr.bf16.mxu0 %v786_v8  ;;  %745 = vmatprep.mubr.f32.mxu0 %v1345_v15  ;;  %v467_v19 = vld [vmem:[#allocation7 + $0x88] sm:$0xff]  ;;  %v450_v20 = vld [vmem:[#allocation7] sm:$0xff]  ;;  %v468_v23 = vld [vmem:[#allocation7 + $0x90] sm:$0xff]  ;;  %v792_v34 = vpack.c.bf16 %v330_v17, %v329_v16  ;;  %p1024_p1 = pnand %p1023_p8, %p1430_p12  ;;  %s1026_s25 = sshll.u32 %s1115_s21, 4  ;;  %s1027_s25 = int_to_ptr.vmem [resolvable:$false] %s1026_s25 }
  0x72   : > { %v814_v21 = vpack.c.bf16 %v467_v19, %v466_v18  ;;  %v451_v22 = vld [vmem:[#allocation7 + $0x8] sm:$0xff]  ;;  %v469_v24 = vld [vmem:[#allocation7 + $0x98] sm:$0xff]  ;;  %v452_v27 = vld [vmem:[#allocation7 + $0x10] sm:$0xff]  ;;  %s1028_s17 = scalar_lea.vmem %s1027_s25, 256  ;;  %p1029_p3 = scmp.lt.s32.totalorder %s1363_s11, %s1027_s25 }
  0x73   : > { %v816_v25 = vpack.c.bf16 %v451_v22, %v450_v20  ;;  %v818_v26 = vpack.c.bf16 %v469_v24, %v468_v23  ;;  %v453_v28 = vld [vmem:[#allocation7 + $0x18] sm:$0xff]  ;;  %v470_v29 = vld [vmem:[#allocation7 + $0xa0] sm:$0xff]  ;;  %v347_v30 = vld [vmem:[#allocation5 + $0xb0] sm:$0xff]  ;;  %p1025_p10 = pneg %p1024_p1  ;;  %p1030_p5 = scmp.lt.s32.totalorder %s1028_s17, %s1022_s16 }
  0x74   : > { %v348_v31 = vld [vmem:[#allocation5 + $0xb8] sm:$0xff]  ;;  %815 = vmatprep.subr.bf16.mxu1 %v814_v21  ;;  %v471_v32 = vld [vmem:[#allocation7 + $0xa8] sm:$0xff]  ;;  %v820_v33 = vpack.c.bf16 %v453_v28, %v452_v27  ;;  %v454_v36 = vld [vmem:[#allocation7 + $0x20] sm:$0xff] }
  0x75   : > { %817 = vmatpush3.bf16.msra.mxu1 %v816_v25  ;;  %v822_v35 = vpack.c.bf16 %v471_v32, %v470_v29  ;;  %v455_v37 = vld [vmem:[#allocation7 + $0x28] sm:$0xff]  ;;  %v794_v38 = vpack.c.bf16 %v348_v31, %v347_v30  ;;  %v331_v40 = vld [vmem:[#allocation5 + $0x30] sm:$0xff]  ;;  %v332_v41 = vld [vmem:[#allocation5 + $0x38] sm:$0xff]  ;;  %p1031_p9 = por %p1030_p5, %p1029_p3 }
  0x76   : > { %819 = vmatprep.subr.bf16.mxu1 %v818_v26  ;;  %v824_v39 = vpack.c.bf16 %v455_v37, %v454_v36  ;;  %v349_v42 = vld [vmem:[#allocation5 + $0xc0] sm:$0xff]  ;;  %v350_v43 = vld [vmem:[#allocation5 + $0xc8] sm:$0xff]  ;;  %v796_v44 = vpack.c.bf16 %v332_v41, %v331_v40  ;;  %v351_v48 = vld [vmem:[#allocation5 + $0xd0] sm:$0xff] }
  0x77   : > { %v798_v45 = vpack.c.bf16 %v350_v43, %v349_v42  ;;  %v333_v46 = vld [vmem:[#allocation5 + $0x40] sm:$0xff]  ;;  %v334_v47 = vld [vmem:[#allocation5 + $0x48] sm:$0xff]  ;;  %v352_v49 = vld [vmem:[#allocation5 + $0xd8] sm:$0xff]  ;;  %p1032_p11 = pnand %p1031_p9, %p1025_p10 }
  0x78   : > { %789 = vmatpush3.bf16.xpose.msra.mxu0 %v788_v13  ;;  %v800_v50 = vpack.c.bf16 %v334_v47, %v333_v46  ;;  %v802_v51 = vpack.c.bf16 %v352_v49, %v351_v48  ;;  %v335_v52 = vld [vmem:[#allocation5 + $0x50] sm:$0xff]  ;;  %v336_v53 = vld [vmem:[#allocation5 + $0x58] sm:$0xff]  ;;  %v353_v54 = vld [vmem:[#allocation5 + $0xe0] sm:$0xff] }
  0x79   : > { %791 = vmatprep.subr.bf16.mxu0 %v790_v14  ;;  %821 = vmatpush3.bf16.msra.mxu1 %v820_v33  ;;  %v354_v55 = vld [vmem:[#allocation5 + $0xe8] sm:$0xff]  ;;  %v804_v56 = vpack.c.bf16 %v336_v53, %v335_v52  ;;  %v337_v58 = vld [vmem:[#allocation5 + $0x60] sm:$0xff]  ;;  %v355_v60 = vld [vmem:[#allocation5 + $0xf0] sm:$0xff]  ;;  %v359_v33 = vlaneseq }
  0x7a   : > { %823 = vmatprep.subr.bf16.mxu1 %v822_v35  ;;  %v806_v57 = vpack.c.bf16 %v354_v55, %v353_v54  ;;  %v338_v59 = vld [vmem:[#allocation5 + $0x68] sm:$0xff]  ;;  %v356_v61 = vld [vmem:[#allocation5 + $0xf8] sm:$0xff]  ;;  %v339_v0 = vld [vmem:[#allocation5 + $0x70] sm:$0xff] }
  0x7b   : > { %v808_v62 = vpack.c.bf16 %v338_v59, %v337_v58  ;;  %v810_v63 = vpack.c.bf16 %v356_v61, %v355_v60  ;;  %v340_v1 = vld [vmem:[#allocation5 + $0x78] sm:$0xff]  ;;  %v472_v3 = vld [vmem:[#allocation7 + $0xb0] sm:$0xff]  ;;  %v474_v9 = vld [vmem:[#allocation7 + $0xc0] sm:$0xff] }
  0x7c   : > { %v812_v2 = vpack.c.bf16 %v340_v1, %v339_v0  ;;  %v473_v4 = vld [vmem:[#allocation7 + $0xb8] sm:$0xff]  ;;  %v456_v6 = vld [vmem:[#allocation7 + $0x30] sm:$0xff]  ;;  %v475_v10 = vld [vmem:[#allocation7 + $0xc8] sm:$0xff] }
  0x7d   : > { %825 = vmatpush3.bf16.msra.mxu1 %v824_v39  ;;  %v826_v5 = vpack.c.bf16 %v473_v4, %v472_v3  ;;  %v457_v7 = vld [vmem:[#allocation7 + $0x38] sm:$0xff]  ;;  %v830_v11 = vpack.c.bf16 %v475_v10, %v474_v9  ;;  %v458_v12 = vld [vmem:[#allocation7 + $0x40] sm:$0xff]  ;;  %v459_v13 = vld [vmem:[#allocation7 + $0x48] sm:$0xff] }
  0x7e   : > { %v828_v8 = vpack.c.bf16 %v457_v7, %v456_v6  ;;  %v832_v14 = vpack.c.bf16 %v459_v13, %v458_v12  ;;  %v476_v16 = vld [vmem:[#allocation7 + $0xd0] sm:$0xff]  ;;  %v477_v17 = vld [vmem:[#allocation7 + $0xd8] sm:$0xff]  ;;  %v478_v21 = vld [vmem:[#allocation7 + $0xe0] sm:$0xff] }
  0x7f   : > { %827 = vmatprep.subr.bf16.mxu1 %v826_v5  ;;  %v834_v18 = vpack.c.bf16 %v477_v17, %v476_v16  ;;  %v461_v19 = vld [vmem:[#allocation7 + $0x58] sm:$0xff]  ;;  %v479_v22 = vld [vmem:[#allocation7 + $0xe8] sm:$0xff]  ;;  %v462_v24 = vld [vmem:[#allocation7 + $0x60] sm:$0xff] }
  0x80   : > { %793 = vmatpush3.bf16.xpose.msra.mxu0 %v792_v34  ;;  %v838_v23 = vpack.c.bf16 %v479_v22, %v478_v21  ;;  %v463_v25 = vld [vmem:[#allocation7 + $0x68] sm:$0xff]  ;;  %v480_v27 = vld [vmem:[#allocation7 + $0xf0] sm:$0xff]  ;;  %v481_v28 = vld [vmem:[#allocation7 + $0xf8] sm:$0xff]  ;;  %v360_v34 = vshrl.u32 %v359_v33, 7 }
  0x81   : > { %795 = vmatprep.subr.bf16.mxu0 %v794_v38  ;;  %829 = vmatpush3.bf16.msra.mxu1 %v828_v8  ;;  %v840_v26 = vpack.c.bf16 %v463_v25, %v462_v24  ;;  %v842_v29 = vpack.c.bf16 %v481_v28, %v480_v27  ;;  %v464_v30 = vld [vmem:[#allocation7 + $0x70] sm:$0xff]  ;;  %v465_v31 = vld [vmem:[#allocation7 + $0x78] sm:$0xff] }
  0x82   : > { %831 = vmatprep.subr.bf16.mxu1 %v830_v11  ;;  %v844_v32 = vpack.c.bf16 %v465_v31, %v464_v30  ;;  %v361_v35 = vsub.s32 0, %v360_v34  ;;  %v357_v36 = vld [vmem:[%s1412_s2] sm:$0x3]  ;;  %v365_v37 = vsub.s32 1, %v360_v34 }
  0x84   : > { %v362_v38 = vrot.slane %v357_v36, %v361_v35  ;;  %v366_v39 = vrot.slane %v357_v36, %v365_v37 }
  0x85   : > { %833 = vmatpush3.bf16.msra.mxu1 %v832_v14 }
  0x86   : > { %835 = vmatprep.subr.bf16.mxu1 %v834_v18 }
  0x88   : > { %797 = vmatpush3.bf16.xpose.msra.mxu0 %v796_v44 }
  0x89   : > { %799 = vmatprep.subr.bf16.mxu0 %v798_v45 }
  0x90   : > { %801 = vmatpush3.bf16.xpose.msra.mxu0 %v800_v50 }
  0x91   : > { %803 = vmatprep.subr.bf16.mxu0 %v802_v51 }
  0x98   : > { %805 = vmatpush3.bf16.xpose.msra.mxu0 %v804_v56 }
  0x99   : > { %807 = vmatprep.subr.bf16.mxu0 %v806_v57  ;;  %v708_v57 = vld [vmem:[%s1414_s4] ss:$0 sm:$0xff] }
  0xa0   : > { %809 = vmatpush3.bf16.xpose.msra.mxu0 %v808_v62 }
  0xa1   : > { %811 = vmatprep.subr.bf16.mxu0 %v810_v63 }
  0xa8   : > { %813 = vmatpush3.bf16.xpose.msra.mxu0 %v812_v2 }
  0xaf   : > { %746 = vmatmul.mubr.f32.vlgmr.msra.gmra.mrb[0].mxu0 %v1345_v15  ;;  %v460_v15 = vld [vmem:[#allocation7 + $0x50] sm:$0xff] }
  0xb0   : > { %v836_v20 = vpack.c.bf16 %v461_v19, %v460_v15 }
  0xb2   : > { %837 = vmatpush3.bf16.msra.mxu1 %v836_v20 }
  0xb3   : > { %839 = vmatprep.subr.bf16.mxu1 %v838_v23 }
  0xb6   : > { %841 = vmatpush3.bf16.msra.mxu1 %v840_v26 }
  0xb7   : > { %843 = vmatprep.subr.bf16.mxu1 %v842_v29 }
  0xba   : > { %845 = vmatpush3.bf16.msra.mxu1 %v844_v32 }
 0x182   : > { %v435_v40 = vpop.f32.mrb[0].mxu0 }
 0x183   : > { %v436_v41 = vadd.f32 %v435_v40, %v362_v38  ;;  %v437_v42 = vpop.f32.mrb[1].mxu0 }
 0x184   : > { %v438_v43 = vadd.f32 %v437_v42, %v366_v39 }
 0x185   : > { %v442_v44 = vmul.f32 0.70710677, %v436_v41  ;;  %v440_v51 = vmul.f32 0.5, %v436_v41 }
 0x186   : > { %v443_v45 = vmul.f32 0.70710677, %v438_v43  ;;  %v441_v49 = vmul.f32 0.5, %v438_v43 }
 0x187   : > { %932 = verf.f32 %v442_v44 }
 0x188   : > { %934 = verf.f32 %v443_v45 }
 0x191   : > { %v933_v46 = vpop.eup %932 }
 0x192   : > { %v935_v47 = vpop.eup %934  ;;  %v446_v48 = vadd.f32 1.0, %v933_v46 }
 0x193   : > { %v447_v50 = vadd.f32 1.0, %v935_v47 }
 0x194   : > { %v448_v53 = vmul.f32 %v446_v48, %v440_v51 }
 0x195   : > { %v449_v52 = vmul.f32 %v447_v50, %v441_v49 }
 0x197   : > { %546 = vmatprep.mubr.f32.mxu1 %v449_v52 }
 0x198   : > { %547 = vmatmul.mubr.f32.vlgmr.msra.gmra.mrb[0].mxu1 %v448_v53 }
 0x26b   : > { %v779_v54 = vpop.f32.mrb[0].mxu1 }
 0x26c   : > { %v780_v55 = vpop.f32.mrb[1].mxu1 }
 0x26d   : > { %v781_v56 = vadd.f32 %v780_v55, %v779_v54 }
 0x26f   : > { %v565_v58 = vadd.f32 %v781_v56, %v708_v57 }
 0x271   : > { %566 = vst [vmem:[%s310_s9] sm:$0xff] %v565_v58 }
 0x272   : > { %1035 = shalt.err (!%p1032_p11)
}
 0x273   : > { %s1036_s13 = scalar_lea.hbm %s1361_s14, 128  ;;  %s1040_s30 = scalar_lea.hbm %s1415_s5, 256 }
 0x274   : > { %p1037_p0 = scmp.ne.s32.totalorder %s1361_s14, %s1036_s13  ;;  %p1041_p6 = scmp.lt.u32.totalorder %s1361_s14, %s1415_s5 }
 0x275   : > { %p1042_p7 = scmp.lt.u32.totalorder %s1040_s30, %s1036_s13  ;;  %p1044_p8 = scmp.lt.u32.totalorder %s1036_s13, %s1361_s14 }
 0x276   : > { %p1038_p4 = pnand %p1037_p0, %p1430_p12 }
 0x277   : > { %p1043_p2 = por %p1042_p7, %p1041_p6 }
 0x278   : > { %p1039_p13 = pneg %p1038_p4 }
 0x279   : > { %p1045_p1 = por %p1044_p8, %p1043_p2 }
 0x27b   : > { %p1046_p10 = pnand %p1045_p1, %p1039_p13 }
 0x27d   : > { %1049 = shalt.err (!%p1046_p10)
}
 0x27e   : > { %856 = dma.vmem_to_hbm [thread:$0]  (%p1430_p12), %s1363_s11, 128, %s1361_s14, %s568_s10  }
 0x27f PF: > { %s593_s9 = sand.u32 1, %s1088_s18   ;;  %p1431_p3 = scmp.ne.s32.totalorder %s1423_s29, 0 }
 0x280   : > { %p1432_p5 = scmp.ge.s32.totalorder %s1108_s23, 2  ;;  %s594_s15 = scalar_lea.sflag [#allocation4], %s593_s9 }
 0x282   : > { %p870_p9 = pnand %p1432_p5, %p1431_p3 }
 0x284   : > { %1083 = dma.done.wait (!%p870_p9), %s594_s15, 128  }
 0x285   : > { %1085 = vsyncadd (!%p870_p9), %s594_s15, 4294967168  ;;  %s22_s23 = sadd.s32 1, %s1108_s23   ;;  %s1433_s18 = smov %s1092_s19 }
 0x286   : > { %p19_p11 = scmp.ge.s32.totalorder %s22_s23, 4   ;;  %s1434_s19 = smov %s1096_s20 }
 0x287   : > { %s1435_s20 = smov %s1288_s6  ;;  %s1436_s21 = smov %s1104_s22 }
 0x288   : > { %s1437_s22 = smov %s1439_s12  ;;  %21 = sbr.rel (!%p19_p11) target bundleno = 7 (0x7), region = 106 }
 0x28f   :  { %599 = vsyncpa [#allocation3], 1 }
 0x290   :  { %601 = vsyncpa [#allocation3 + $0x1], 1 }
 0x291   :  { %602 = vsyncpa [#allocation6], 1 }
 0x292   :  { %603 = vsyncpa [#allocation4], 1 }
 0x293   :  { %605 = vsyncpa [#allocation4 + $0x1], 1 }

</bundles_post_ra>
